<compile_context>
chip_gen: v7x
topology: tpu7x:2x2x1
jax: 0.10.0
libtpu: 0.0.40
codegen_flags: <defaults>
</compile_context>

<pallas_src>
import jax
import jax.numpy as jnp
from jax.experimental import pallas as pl
from jax.experimental.pallas import tpu as pltpu


def _nsp_head_kernel(x_ref, w_ref, b_ref, o_ref):
    # x_ref: (TB, H)  w_ref: (H, 2)  b_ref: (1, 2)  o_ref: (TB, 2)
    acc = jnp.dot(x_ref[...], w_ref[...], preferred_element_type=jnp.float32)
    o_ref[...] = (acc + b_ref[...].astype(jnp.float32)).astype(o_ref.dtype)


def _sublane_multiple(dtype):
    """Minimum second-to-last-dim granularity for a given dtype on TPU."""
    itemsize = jnp.dtype(dtype).itemsize
    if itemsize >= 4:
        return 8
    if itemsize == 2:
        return 16
    return 32  # int8 / fp8


def _align_block_b(blk, B, sub):
    """Make blk legal: either a multiple of `sub`, or the full batch extent."""
    if blk >= B:
        return B
    blk = max(sub, (blk // sub) * sub)
    if blk >= B:
        return B
    return blk


def _default_block_b(B, H, dtype, vmem_budget_bytes=24 * 1024 * 1024):
    """Pick a batch tile: big enough to hit the HBM roofline, small enough for
    every TPU generation, and small enough that the batch axis has >= 2 grid
    steps (v7x megacore) whenever B allows it."""
    sub = _sublane_multiple(dtype)
    itemsize = jnp.dtype(dtype).itemsize
    # Double-buffered x tile = 2 * block_b * H * itemsize must fit the budget.
    cap_from_vmem = max(sub, vmem_budget_bytes // (2 * H * itemsize))
    blk = min(B, 2048, cap_from_vmem)
    if B >= 2 * sub:
        blk = min(blk, pl.cdiv(B, 2))  # force >= 2 parallel grid steps
    return blk


def bert_only_nsp_head(pooled_output, weight, bias, *, block_b=None,
                       stream_dtype=None, out_dtype=None):
    """pooled_output: [B, H], weight: [H, 2] (transposed nn.Linear weight),
    bias: [2]  ->  logits [B, 2]."""
    B, H = pooled_output.shape
    assert weight.shape == (H, 2)
    assert bias.shape == (2,)

    if out_dtype is None:
        out_dtype = pooled_output.dtype
    if stream_dtype is not None:
        pooled_output = pooled_output.astype(stream_dtype)
        weight = weight.astype(stream_dtype)
    elif weight.dtype != pooled_output.dtype:
        weight = weight.astype(pooled_output.dtype)

    x_dtype = pooled_output.dtype
    sub = _sublane_multiple(x_dtype)
    if block_b is None:
        block_b = _default_block_b(B, H, x_dtype)
    block_b = _align_block_b(int(block_b), B, sub)

    # No activation padding: Pallas masks the ragged last tile.  OOB rows of
    # the last x tile only produce OOB output rows, which are never written
    # past B (the output is exactly (B, 2)).
    num_tiles = pl.cdiv(B, block_b)
    bias2d = bias.reshape(1, 2)

    out = pl.pallas_call(
        _nsp_head_kernel,
        out_shape=jax.ShapeDtypeStruct((B, 2), out_dtype),
        grid_spec=pl.GridSpec(
            grid=(num_tiles,),
            in_specs=[
                pl.BlockSpec((block_b, H), lambda i: (i, 0)),  # x tile (streamed)
                pl.BlockSpec((H, 2), lambda i: (0, 0)),        # weight (resident)
                pl.BlockSpec((1, 2), lambda i: (0, 0)),        # bias   (resident)
            ],
            out_specs=pl.BlockSpec((block_b, 2), lambda i: (i, 0)),
        ),
        compiler_params=pltpu.CompilerParams(
            dimension_semantics=("parallel",),   # shardable across v7x's 2 TCs
            vmem_limit_bytes=40 * 1024 * 1024,   # above v5e/v6e defaults, < v7x's 64 MiB
        ),
    )(pooled_output, weight, bias2d)
    return out


if __name__ == "__main__":
    key = jax.random.PRNGKey(0)
    k_x, k_w, k_b = jax.random.split(key, 3)

    batch = 8
    hidden = 32  # config.hidden_size

    pooled_output = jax.random.normal(k_x, (batch, hidden), dtype=jnp.float32)
    # nn.Linear(hidden_size, 2): PyTorch stores weight [2, hidden], bias [2];
    # we keep the weight transposed as [hidden, 2].
    weight = jax.random.normal(k_w, (hidden, 2), dtype=jnp.float32) * 0.02
    bias = jax.random.normal(k_b, (2,), dtype=jnp.float32) * 0.02

    out = jax.block_until_ready(bert_only_nsp_head(pooled_output, weight, bias))
    ref = pooled_output @ weight + bias
    assert out.shape == (batch, 2)
    assert jnp.allclose(out, ref, atol=1e-5, rtol=1e-5)

    # Ragged batch (B not a multiple of block_b): no wrapper-side padding pass,
    # Pallas masks the last partial tile.
    big_B = 1000
    x_big = jax.random.normal(jax.random.PRNGKey(1), (big_B, hidden), dtype=jnp.float32)
    out_big = jax.block_until_ready(
        bert_only_nsp_head(x_big, weight, bias, block_b=256)
    )
    ref_big = x_big @ weight + bias
    assert out_big.shape == (big_B, 2)
    assert jnp.allclose(out_big, ref_big, atol=1e-5, rtol=1e-5)

    # bf16 streaming path (halves HBM traffic on the dominant [B, H] read),
    # f32 accumulation in-kernel, f32 logits out; 16-row sublane alignment.
    out_bf16 = jax.block_until_ready(
        bert_only_nsp_head(x_big, weight, bias,
                           stream_dtype=jnp.bfloat16, out_dtype=jnp.float32)
    )
    assert out_bf16.shape == (big_B, 2)
    assert jnp.allclose(out_bf16, ref_big, atol=5e-2, rtol=5e-2)

    print("KERNEL_OK")
</pallas_src>

<mosaic_0001>
module attributes {stable_mosaic.version = 11 : i64} {
  func.func @_nsp_head_kernel(%arg0: i32, %arg1: memref<8x32xf32, #tpu.memory_space<vmem>>, %arg2: memref<32x2xf32, #tpu.memory_space<vmem>>, %arg3: memref<1x2xf32, #tpu.memory_space<vmem>>, %arg4: memref<8x2xf32, #tpu.memory_space<vmem>>) attributes {dimension_semantics = [#tpu.dimension_semantics<parallel>], iteration_bounds = array<i64: 1>, scalar_prefetch = 0 : i64, scratch_operands = 0 : i64, tpu.core_type = #tpu.core_type<tc>, window_params = [{transform_indices = @transform_0, window_bounds = array<i64: 8, 32>}, {pipeline_mode = #tpu.pipeline_mode<synchronous>, transform_indices = @transform_1, window_bounds = array<i64: 32, 2>}, {pipeline_mode = #tpu.pipeline_mode<synchronous>, transform_indices = @transform_2, window_bounds = array<i64: 1, 2>}, {transform_indices = @transform_3, window_bounds = array<i64: 8, 2>}]} {
    %c0 = arith.constant 0 : index
    %c0_0 = arith.constant 0 : index
    %0 = vector.load %arg1[%c0, %c0_0] : memref<8x32xf32, #tpu.memory_space<vmem>>, vector<8x32xf32>
    %c0_1 = arith.constant 0 : index
    %c0_2 = arith.constant 0 : index
    %1 = vector.load %arg2[%c0_1, %c0_2] : memref<32x2xf32, #tpu.memory_space<vmem>>, vector<32x2xf32>
    %cst = arith.constant dense<0.000000e+00> : vector<8x2xf32>
    %2 = tpu.matmul %0, %1, %cst {dimension_numbers = #tpu.dot_dimension_numbers<[1], [0], [0], [1], [0, 0, 1, 1], [], []>} : vector<8x32xf32>, vector<32x2xf32>, vector<8x2xf32> -> vector<8x2xf32>
    %c0_3 = arith.constant 0 : index
    %c0_4 = arith.constant 0 : index
    %3 = vector.load %arg3[%c0_3, %c0_4] : memref<1x2xf32, #tpu.memory_space<vmem>>, vector<1x2xf32>
    %4 = vector.broadcast %3 : vector<1x2xf32> to vector<8x2xf32>
    %5 = arith.addf %2, %4 : vector<8x2xf32>
    %c0_5 = arith.constant 0 : index
    %c0_6 = arith.constant 0 : index
    %6 = vector.load %arg4[%c0_5, %c0_6] : memref<8x2xf32, #tpu.memory_space<vmem>>, vector<8x2xf32>
    tpu.vector_store %arg4[%c0_5, %c0_6], %5 {strides = array<i32>} : memref<8x2xf32, #tpu.memory_space<vmem>>, vector<8x2xf32>,
    return
  }
  func.func @transform_0(%arg0: i32) -> (i32, i32) {
    %c0_i32 = arith.constant 0 : i32
    %c0_i32_0 = arith.constant 0 : i32
    return %arg0, %c0_i32 : i32, i32
  }
  func.func @transform_1(%arg0: i32) -> (i32, i32) {
    %c0_i32 = arith.constant 0 : i32
    %c0_i32_0 = arith.constant 0 : i32
    %c0_i32_1 = arith.constant 0 : i32
    return %c0_i32, %c0_i32_0 : i32, i32
  }
  func.func @transform_2(%arg0: i32) -> (i32, i32) {
    %c0_i32 = arith.constant 0 : i32
    %c0_i32_0 = arith.constant 0 : i32
    %c0_i32_1 = arith.constant 0 : i32
    return %c0_i32, %c0_i32_0 : i32, i32
  }
  func.func @transform_3(%arg0: i32) -> (i32, i32) {
    %c0_i32 = arith.constant 0 : i32
    %c0_i32_0 = arith.constant 0 : i32
    return %arg0, %c0_i32 : i32, i32
  }
}

</mosaic_0001>

<bundles_post_ra>
// kernel: tpu_custom_call.1
= control target key start
LH: loop header
LB: loop body
LE: loop exit
PB: predicated region body
PF: predicated region fallthrough
CT: control target
= control target key end

     0   :  { %v133_v0 = vmov 0.0|0.0   ;;  %vm134_vm0 = vmmov 0   ;;  %v135_v4 = vmov 0.0   ;;  %vm26_vm1 = vcmask 261120   ;;  %s177_s1 = inlined_call_operand.vmem [shape: f32[32,2], index: 1, kind: input, shape index: {}]   ;;  %s178_s0 = inlined_call_operand.vmem [shape: f32[8,32], index: 0, kind: input, shape index: {}]   ;;  %s179_s2 = inlined_call_operand.vmem [shape: f32[1,2], index: 2, kind: input, shape index: {}]   ;;  %s180_s3 = inlined_call_operand.vmem [shape: f32[8,2], index: 3, kind: output, shape index: {}]  }
   0x1   :  { %124 = vmatprep.subr.bf16.mxu0 %v133_v0  ;;  %v15_v1 = vld [vmem:[%s177_s1] sm:$0xff]  ;;  %v16_v2 = vld [vmem:[%s177_s1 + $0x8] sm:$0xff]  ;;  %v17_v3 = vld [vmem:[%s177_s1 + $0x10] sm:$0xff]  ;;  %121 = vmatprep.mubr.msk.f32.mxu0 %vm134_vm0, %v135_v4  ;;  %vm100_vm2 = vcmask 15360  }
   0x2   :  { %v125_v5 = vpack.c.bf16 %v16_v2, %v15_v1  ;;  %v18_v6 = vld [vmem:[%s177_s1 + $0x18] sm:$0xff]  ;;  %v14_v8 = vld [vmem:[%s178_s0] sm:$0xff] }
   0x3   :  { %v128_v7 = vpack.c.bf16 %v18_v6, %v17_v3  ;;  %v106_v9 = vld [vmem:[%s179_s2] ss:$0 sm:$0xff] }
   0x4   :  { %126 = vmatpush3.bf16.msra.mxu0 %v125_v5 }
   0x5   :  { %127 = vmatprep.subr.bf16.mxu0 %v133_v0 }
   0x8   :  { %129 = vmatpush3.bf16.msra.mxu0 %v128_v7 }
   0xb   :  { %122 = vmatmul.mubr.msk.f32.vlgmr.msra.gmra.mrb[0].mxu0 %vm26_vm1, %v14_v8 }
  0xde   :  { %v96_v10 = vpop.f32.mrb[0].mxu0 }
  0xdf   :  { %v97_v11 = vadd.f32 %v106_v9, %v96_v10  ;;  %v123_v12 = vpop.f32.mrb[1].mxu0 }
  0xe1   :  { %101 = vst.msk [vmem:[%s180_s3] sm:$0xff] %vm100_vm2, %v97_v11 }

</bundles_post_ra>
